<compile_context>
chip_gen: v7x
topology: tpu7x:2x2x1
jax: 0.10.0
libtpu: 0.0.40
codegen_flags: <defaults>
</compile_context>

<pallas_src>
import functools

import jax
import jax.numpy as jnp
from jax.experimental import pallas as pl
from jax.experimental.pallas import tpu as pltpu


# ----------------------------- config ---------------------------------------
class Config:
    use_posenc = False      # -> first layer input dim = 2
    n_freqs = 4             # unused when use_posenc is False
    hidden_size = 32
    n_layers = 4            # first + (n_layers - 2) intermediate + final
    dropout = 0.0           # -> self.dropout is None in the reference module


FINAL_SIZE = 3              # e.g. RGB output


def _round_up(a, b):
    return pl.cdiv(a, b) * b


# ----------------------------- kernel ---------------------------------------
def _mlp_kernel(x_ref, w0_ref, wmid_ref, wf_ref, b_ref, o_ref, *,
                n_mid, hidden, in_dim, final_size):
    """Fused feature-major MLP for one tile of points.

    x_ref    : (in_dim, tile_m)        f32  -- points live in the 128-lane axis
    w0_ref   : (H, in_dim)             f32  -- layer-0 weight (VPU path)
    wmid_ref : (max(n_mid,1), H, H)    bf16 -- intermediate weights (MXU path)
    wf_ref   : (final_size, H)         f32  -- final weight (VPU path)
    b_ref    : (n_linear, H, 1)        f32  -- all biases, zero-padded
    o_ref    : (final_size, tile_m)    f32
    """
    H = hidden
    x = x_ref[...]                                     # (in_dim, tile_m) f32
    tile_m = x.shape[1]

    # ---- layer 0: K == in_dim (2) broadcast FMAs on the VPU, all f32 --------
    w0 = w0_ref[...]                                   # (H, in_dim) f32
    b0 = b_ref[0]                                      # (H, 1)      f32
    if in_dim <= 8:
        h = jnp.broadcast_to(b0, (H, tile_m))
        for k in range(in_dim):
            h = h + w0[:, k:k + 1] * x[k:k + 1, :]
    else:  # posenc path (in_dim = 4 * n_freqs): use the MXU
        h = jnp.dot(w0.astype(jnp.bfloat16), x.astype(jnp.bfloat16),
                    preferred_element_type=jnp.float32) + b0
    h = jnp.maximum(h, 0.0)

    # ---- intermediate layers: MXU, bf16 operands, f32 accumulation ----------
    # One bf16 cast of h per layer (MXU operand only); bias already f32.
    for i in range(n_mid):
        h = jnp.dot(wmid_ref[i], h.astype(jnp.bfloat16),
                    preferred_element_type=jnp.float32) + b_ref[i + 1]
        h = jnp.maximum(h, 0.0)
    # TODO(synk): explicit matmul_push_rhs weight-stationary MXU driving not
    # used; only worth it if a bundle dump shows the 32x32 weight re-pushed.

    # ---- final layer: final_size (=3) rows computed on the VPU in f32 -------
    # (avoids a third, ~1.5%-occupancy MXU pass whose 29/32 rows are padding)
    wf = wf_ref[...]                                   # (final_size, H) f32
    out = jnp.broadcast_to(b_ref[n_mid + 1, 0:final_size],
                           (final_size, tile_m))
    for k in range(H):
        out = out + wf[:, k:k + 1] * h[k:k + 1, :]
    o_ref[...] = out.astype(o_ref.dtype)
    # TODO(synk): dropout path omitted (config.dropout == 0.0 -> no-op module).


# ----------------------------- wrapper ---------------------------------------
def rf_base_forward(x, params, *, hidden_size, final_size, tile_m=256):
    """Forward pass of RFBase.

    x      : (N, in_dim) float array (point-major, like the PyTorch module).
    params : list of (W, b) in PyTorch layout -- W: (out, in), b: (out,).
    Returns (N, final_size) float32.
    """
    n, in_dim = x.shape
    n_linear = len(params)
    assert n_linear >= 2
    n_mid = n_linear - 2
    H = hidden_size
    assert H >= final_size and H >= in_dim or not params  # bias packing width

    # ---- split parameter packing (all tiny, VMEM-resident) -------------------
    w0 = params[0][0].astype(jnp.float32)              # (H, in_dim)  VPU path
    wf = params[-1][0].astype(jnp.float32)             # (final, H)   VPU path
    if n_mid > 0:
        w_mid = jnp.stack([params[1 + i][0] for i in range(n_mid)]
                          ).astype(jnp.bfloat16)       # (n_mid, H, H) MXU path
    else:
        w_mid = jnp.zeros((1, H, H), jnp.bfloat16)     # dummy, unused
    biases = jnp.zeros((n_linear, H), jnp.float32)
    for i, (_, b) in enumerate(params):
        biases = biases.at[i, :b.shape[0]].set(b.astype(jnp.float32))
    biases = biases[..., None]                          # (n_linear, H, 1) f32

    # ---- tiling: lane-dense point tiles, >= 2 grid steps when possible -------
    n_ceil = _round_up(n, 128)
    half = _round_up(pl.cdiv(n_ceil, 2), 128)           # guarantee grid >= 2
    tile_m = max(128, min(tile_m, half))                 # 256-512 keeps h in vregs
    n_pad = _round_up(n, tile_m)
    grid_len = n_pad // tile_m

    # Feature-major layout: point dimension fills the 128-lane axis. x stays
    # f32 into the kernel (no wrapper bf16 pass); padded tail cols are computed
    # on zeros and sliced off below.
    x_t = x.astype(jnp.float32).T                        # (in_dim, N)
    if n_pad != n:
        x_t = jnp.pad(x_t, ((0, 0), (0, n_pad - n)))

    kernel = functools.partial(_mlp_kernel, n_mid=n_mid, hidden=H,
                               in_dim=in_dim, final_size=final_size)

    out_t = pl.pallas_call(
        kernel,
        out_shape=jax.ShapeDtypeStruct((final_size, n_pad), jnp.float32),
        grid_spec=pltpu.PrefetchScalarGridSpec(
            num_scalar_prefetch=0,
            grid=(grid_len,),
            in_specs=[
                # one lane-dense point tile per grid step (double-buffered)
                pl.BlockSpec((in_dim, tile_m), lambda i: (0, i)),
                # tiny parameter buffers: constant index_map -> VMEM-resident,
                # fetched once (no re-DMA across grid steps)
                pl.BlockSpec(w0.shape, lambda i: (0, 0)),
                pl.BlockSpec(w_mid.shape, lambda i: (0, 0, 0)),
                pl.BlockSpec(wf.shape, lambda i: (0, 0)),
                pl.BlockSpec(biases.shape, lambda i: (0, 0, 0)),
            ],
            # keep the output (final_size, N): lane-dense unmasked stores
            out_specs=pl.BlockSpec((final_size, tile_m), lambda i: (0, i)),
        ),
        compiler_params=pltpu.CompilerParams(
            dimension_semantics=("parallel",),   # shards point tiles across TCs
        ),
    )(x_t, w0, w_mid, wf, biases)

    return out_t[:, :n].T                                # (N, final_size) f32


# ----------------------- deterministic parameter init ------------------------
def init_params(key, cfg, final_size):
    in_dim = 2 if not cfg.use_posenc else 4 * cfg.n_freqs
    dims = [in_dim] + [cfg.hidden_size] * (cfg.n_layers - 1) + [final_size]
    params = []
    for i in range(len(dims) - 1):
        key, kw, kb = jax.random.split(key, 3)
        bound = 1.0 / float(dims[i]) ** 0.5
        w = jax.random.uniform(kw, (dims[i + 1], dims[i]), jnp.float32,
                               minval=-bound, maxval=bound)        # (out, in)
        b = jax.random.uniform(kb, (dims[i + 1],), jnp.float32,
                               minval=-bound, maxval=bound)
        params.append((w, b))
    return params, in_dim


# ----------------------------- references ------------------------------------
_HI = jax.lax.Precision.HIGHEST


def rf_base_reference(x, params):
    """Pure-JAX f32 reference (matches the PyTorch module)."""
    h = x
    for i, (w, b) in enumerate(params):
        h = jnp.dot(h, w.T, precision=_HI) + b
        if i < len(params) - 1:
            h = jnp.maximum(h, 0.0)
    return h


def rf_base_reference_matched(x, params):
    """Precision-matched reference: f32 first/final layers, bf16-weight
    intermediate layers with f32 accumulation (mirrors the kernel)."""
    n_linear = len(params)
    w0, b0 = params[0]
    h = jnp.dot(x.astype(jnp.float32), w0.T, precision=_HI) + b0
    h = jnp.maximum(h, 0.0)
    for i in range(1, n_linear - 1):
        w, b = params[i]
        h = jnp.dot(h.astype(jnp.bfloat16), w.astype(jnp.bfloat16).T,
                    preferred_element_type=jnp.float32) + b
        h = jnp.maximum(h, 0.0)
    wf, bf = params[-1]
    return jnp.dot(h, wf.T, precision=_HI) + bf


if __name__ == "__main__":
    cfg = Config()
    key = jax.random.PRNGKey(0)
    params, in_dim = init_params(key, cfg, FINAL_SIZE)

    # Small demo: 1024 2-D coordinates; tile_m=256 -> grid=(4,), so both v7x
    # TensorCores get work (no effect on single-TC v5e/v6e) and activations
    # stay far below the 64-vreg budget.
    n_points = 1024
    key, kx = jax.random.split(key)
    x = jax.random.uniform(kx, (n_points, in_dim), jnp.float32,
                           minval=-1.0, maxval=1.0)

    fwd = jax.jit(functools.partial(rf_base_forward,
                                    hidden_size=cfg.hidden_size,
                                    final_size=FINAL_SIZE,
                                    tile_m=256))
    out = jax.block_until_ready(fwd(x, params))
    assert out.shape == (n_points, FINAL_SIZE)

    # Tight check against the precision-matched reference.
    ref_q = rf_base_reference_matched(x, params)
    assert jnp.allclose(out, ref_q, atol=1e-2, rtol=1e-2), \
        "mismatch vs precision-matched reference"

    # Sanity check against the pure-f32 reference (loosened for bf16
    # intermediate-layer weights).
    ref = rf_base_reference(x, params)
    assert jnp.allclose(out, ref, atol=1e-1, rtol=1e-1), \
        "mismatch vs f32 reference"

    print("KERNEL_OK")
</pallas_src>

<mosaic_0001>
module attributes {stable_mosaic.version = 11 : i64} {
  func.func @_mlp_kernel(%arg0: i32, %arg1: memref<2x256xf32, #tpu.memory_space<vmem>>, %arg2: memref<32x2xf32, #tpu.memory_space<vmem>>, %arg3: memref<2x32x32xbf16, #tpu.memory_space<vmem>>, %arg4: memref<3x32xf32, #tpu.memory_space<vmem>>, %arg5: memref<4x32x1xf32, #tpu.memory_space<vmem>>, %arg6: memref<3x256xf32, #tpu.memory_space<vmem>>) attributes {dimension_semantics = [#tpu.dimension_semantics<parallel>], iteration_bounds = array<i64: 4>, scalar_prefetch = 0 : i64, scratch_operands = 0 : i64, tpu.core_type = #tpu.core_type<tc>, window_params = [{transform_indices = @transform_0, window_bounds = array<i64: 2, 256>}, {pipeline_mode = #tpu.pipeline_mode<synchronous>, transform_indices = @transform_1, window_bounds = array<i64: 32, 2>}, {pipeline_mode = #tpu.pipeline_mode<synchronous>, transform_indices = @transform_2, window_bounds = array<i64: 2, 32, 32>}, {pipeline_mode = #tpu.pipeline_mode<synchronous>, transform_indices = @transform_3, window_bounds = array<i64: 3, 32>}, {pipeline_mode = #tpu.pipeline_mode<synchronous>, transform_indices = @transform_4, window_bounds = array<i64: 4, 32, 1>}, {transform_indices = @transform_5, window_bounds = array<i64: 3, 256>}]} {
    %c0 = arith.constant 0 : index
    %c0_0 = arith.constant 0 : index
    %0 = vector.load %arg1[%c0, %c0_0] : memref<2x256xf32, #tpu.memory_space<vmem>>, vector<2x256xf32>
    %c0_1 = arith.constant 0 : index
    %c0_2 = arith.constant 0 : index
    %1 = vector.load %arg2[%c0_1, %c0_2] : memref<32x2xf32, #tpu.memory_space<vmem>>, vector<32x2xf32>
    %c0_3 = arith.constant 0 : index
    %c0_4 = arith.constant 0 : index
    %c0_5 = arith.constant 0 : index
    %2 = vector.load %arg5[%c0_3, %c0_4, %c0_5] : memref<4x32x1xf32, #tpu.memory_space<vmem>>, vector<1x32x1xf32>
    %3 = vector.shape_cast %2 : vector<1x32x1xf32> to vector<32x1xf32>
    %4 = vector.shape_cast %3 : vector<32x1xf32> to vector<32x1xf32>
    %5 = vector.broadcast %4 : vector<32x1xf32> to vector<32x256xf32>
    %6 = vector.extract_strided_slice %1 {offsets = [0, 0], sizes = [32, 1], strides = [1, 1]} : vector<32x2xf32> to vector<32x1xf32>
    %7 = vector.extract_strided_slice %0 {offsets = [0, 0], sizes = [1, 256], strides = [1, 1]} : vector<2x256xf32> to vector<1x256xf32>
    %8 = vector.broadcast %6 : vector<32x1xf32> to vector<32x256xf32>
    %9 = vector.broadcast %7 : vector<1x256xf32> to vector<32x256xf32>
    %10 = arith.mulf %8, %9 : vector<32x256xf32>
    %11 = arith.addf %5, %10 : vector<32x256xf32>
    %12 = vector.extract_strided_slice %1 {offsets = [0, 1], sizes = [32, 1], strides = [1, 1]} : vector<32x2xf32> to vector<32x1xf32>
    %13 = vector.extract_strided_slice %0 {offsets = [1, 0], sizes = [1, 256], strides = [1, 1]} : vector<2x256xf32> to vector<1x256xf32>
    %14 = vector.broadcast %12 : vector<32x1xf32> to vector<32x256xf32>
    %15 = vector.broadcast %13 : vector<1x256xf32> to vector<32x256xf32>
    %16 = arith.mulf %14, %15 : vector<32x256xf32>
    %17 = arith.addf %11, %16 : vector<32x256xf32>
    %cst = arith.constant 0.000000e+00 : f32
    %18 = vector.broadcast %cst : f32 to vector<32x256xf32>
    %19 = arith.maximumf %17, %18 : vector<32x256xf32>
    %c0_6 = arith.constant 0 : index
    %c0_7 = arith.constant 0 : index
    %c0_8 = arith.constant 0 : index
    %20 = vector.load %arg3[%c0_6, %c0_7, %c0_8] : memref<2x32x32xbf16, #tpu.memory_space<vmem>>, vector<1x32x32xbf16>
    %21 = vector.shape_cast %20 : vector<1x32x32xbf16> to vector<32x32xbf16>
    %22 = arith.truncf %19 : vector<32x256xf32> to vector<32x256xbf16>
    %cst_9 = arith.constant dense<0.000000e+00> : vector<32x256xf32>
    %23 = tpu.matmul %21, %22, %cst_9 {dimension_numbers = #tpu.dot_dimension_numbers<[1], [0], [0], [1], [0, 0, 1, 1], [], []>} : vector<32x32xbf16>, vector<32x256xbf16>, vector<32x256xf32> -> vector<32x256xf32>
    %c1 = arith.constant 1 : index
    %c0_10 = arith.constant 0 : index
    %c0_11 = arith.constant 0 : index
    %24 = vector.load %arg5[%c1, %c0_10, %c0_11] : memref<4x32x1xf32, #tpu.memory_space<vmem>>, vector<1x32x1xf32>
    %25 = vector.shape_cast %24 : vector<1x32x1xf32> to vector<32x1xf32>
    %26 = vector.broadcast %25 : vector<32x1xf32> to vector<32x256xf32>
    %27 = arith.addf %23, %26 : vector<32x256xf32>
    %cst_12 = arith.constant 0.000000e+00 : f32
    %28 = vector.broadcast %cst_12 : f32 to vector<32x256xf32>
    %29 = arith.maximumf %27, %28 : vector<32x256xf32>
    %c1_13 = arith.constant 1 : index
    %c0_14 = arith.constant 0 : index
    %c0_15 = arith.constant 0 : index
    %30 = vector.load %arg3[%c1_13, %c0_14, %c0_15] : memref<2x32x32xbf16, #tpu.memory_space<vmem>>, vector<1x32x32xbf16>
    %31 = vector.shape_cast %30 : vector<1x32x32xbf16> to vector<32x32xbf16>
    %32 = arith.truncf %29 : vector<32x256xf32> to vector<32x256xbf16>
    %cst_16 = arith.constant dense<0.000000e+00> : vector<32x256xf32>
    %33 = tpu.matmul %31, %32, %cst_16 {dimension_numbers = #tpu.dot_dimension_numbers<[1], [0], [0], [1], [0, 0, 1, 1], [], []>} : vector<32x32xbf16>, vector<32x256xbf16>, vector<32x256xf32> -> vector<32x256xf32>
    %c2 = arith.constant 2 : index
    %c0_17 = arith.constant 0 : index
    %c0_18 = arith.constant 0 : index
    %34 = vector.load %arg5[%c2, %c0_17, %c0_18] : memref<4x32x1xf32, #tpu.memory_space<vmem>>, vector<1x32x1xf32>
    %35 = vector.shape_cast %34 : vector<1x32x1xf32> to vector<32x1xf32>
    %36 = vector.broadcast %35 : vector<32x1xf32> to vector<32x256xf32>
    %37 = arith.addf %33, %36 : vector<32x256xf32>
    %cst_19 = arith.constant 0.000000e+00 : f32
    %38 = vector.broadcast %cst_19 : f32 to vector<32x256xf32>
    %39 = arith.maximumf %37, %38 : vector<32x256xf32>
    %c0_20 = arith.constant 0 : index
    %c0_21 = arith.constant 0 : index
    %40 = vector.load %arg4[%c0_20, %c0_21] : memref<3x32xf32, #tpu.memory_space<vmem>>, vector<3x32xf32>
    %c3 = arith.constant 3 : index
    %c0_22 = arith.constant 0 : index
    %c0_23 = arith.constant 0 : index
    %41 = vector.load %arg5[%c3, %c0_22, %c0_23] : memref<4x32x1xf32, #tpu.memory_space<vmem>>, vector<1x3x1xf32>
    %42 = vector.shape_cast %41 : vector<1x3x1xf32> to vector<3x1xf32>
    %43 = vector.shape_cast %42 : vector<3x1xf32> to vector<3x1xf32>
    %44 = vector.broadcast %43 : vector<3x1xf32> to vector<3x256xf32>
    %45 = vector.extract_strided_slice %40 {offsets = [0, 0], sizes = [3, 1], strides = [1, 1]} : vector<3x32xf32> to vector<3x1xf32>
    %46 = vector.extract_strided_slice %39 {offsets = [0, 0], sizes = [1, 256], strides = [1, 1]} : vector<32x256xf32> to vector<1x256xf32>
    %47 = vector.broadcast %45 : vector<3x1xf32> to vector<3x256xf32>
    %48 = vector.broadcast %46 : vector<1x256xf32> to vector<3x256xf32>
    %49 = arith.mulf %47, %48 : vector<3x256xf32>
    %50 = arith.addf %44, %49 : vector<3x256xf32>
    %51 = vector.extract_strided_slice %40 {offsets = [0, 1], sizes = [3, 1], strides = [1, 1]} : vector<3x32xf32> to vector<3x1xf32>
    %52 = vector.extract_strided_slice %39 {offsets = [1, 0], sizes = [1, 256], strides = [1, 1]} : vector<32x256xf32> to vector<1x256xf32>
    %53 = vector.broadcast %51 : vector<3x1xf32> to vector<3x256xf32>
    %54 = vector.broadcast %52 : vector<1x256xf32> to vector<3x256xf32>
    %55 = arith.mulf %53, %54 : vector<3x256xf32>
    %56 = arith.addf %50, %55 : vector<3x256xf32>
    %57 = vector.extract_strided_slice %40 {offsets = [0, 2], sizes = [3, 1], strides = [1, 1]} : vector<3x32xf32> to vector<3x1xf32>
    %58 = vector.extract_strided_slice %39 {offsets = [2, 0], sizes = [1, 256], strides = [1, 1]} : vector<32x256xf32> to vector<1x256xf32>
    %59 = vector.broadcast %57 : vector<3x1xf32> to vector<3x256xf32>
    %60 = vector.broadcast %58 : vector<1x256xf32> to vector<3x256xf32>
    %61 = arith.mulf %59, %60 : vector<3x256xf32>
    %62 = arith.addf %56, %61 : vector<3x256xf32>
    %63 = vector.extract_strided_slice %40 {offsets = [0, 3], sizes = [3, 1], strides = [1, 1]} : vector<3x32xf32> to vector<3x1xf32>
    %64 = vector.extract_strided_slice %39 {offsets = [3, 0], sizes = [1, 256], strides = [1, 1]} : vector<32x256xf32> to vector<1x256xf32>
    %65 = vector.broadcast %63 : vector<3x1xf32> to vector<3x256xf32>
    %66 = vector.broadcast %64 : vector<1x256xf32> to vector<3x256xf32>
    %67 = arith.mulf %65, %66 : vector<3x256xf32>
    %68 = arith.addf %62, %67 : vector<3x256xf32>
    %69 = vector.extract_strided_slice %40 {offsets = [0, 4], sizes = [3, 1], strides = [1, 1]} : vector<3x32xf32> to vector<3x1xf32>
    %70 = vector.extract_strided_slice %39 {offsets = [4, 0], sizes = [1, 256], strides = [1, 1]} : vector<32x256xf32> to vector<1x256xf32>
    %71 = vector.broadcast %69 : vector<3x1xf32> to vector<3x256xf32>
    %72 = vector.broadcast %70 : vector<1x256xf32> to vector<3x256xf32>
    %73 = arith.mulf %71, %72 : vector<3x256xf32>
    %74 = arith.addf %68, %73 : vector<3x256xf32>
    %75 = vector.extract_strided_slice %40 {offsets = [0, 5], sizes = [3, 1], strides = [1, 1]} : vector<3x32xf32> to vector<3x1xf32>
    %76 = vector.extract_strided_slice %39 {offsets = [5, 0], sizes = [1, 256], strides = [1, 1]} : vector<32x256xf32> to vector<1x256xf32>
    %77 = vector.broadcast %75 : vector<3x1xf32> to vector<3x256xf32>
    %78 = vector.broadcast %76 : vector<1x256xf32> to vector<3x256xf32>
    %79 = arith.mulf %77, %78 : vector<3x256xf32>
    %80 = arith.addf %74, %79 : vector<3x256xf32>
    %81 = vector.extract_strided_slice %40 {offsets = [0, 6], sizes = [3, 1], strides = [1, 1]} : vector<3x32xf32> to vector<3x1xf32>
    %82 = vector.extract_strided_slice %39 {offsets = [6, 0], sizes = [1, 256], strides = [1, 1]} : vector<32x256xf32> to vector<1x256xf32>
    %83 = vector.broadcast %81 : vector<3x1xf32> to vector<3x256xf32>
    %84 = vector.broadcast %82 : vector<1x256xf32> to vector<3x256xf32>
    %85 = arith.mulf %83, %84 : vector<3x256xf32>
    %86 = arith.addf %80, %85 : vector<3x256xf32>
    %87 = vector.extract_strided_slice %40 {offsets = [0, 7], sizes = [3, 1], strides = [1, 1]} : vector<3x32xf32> to vector<3x1xf32>
    %88 = vector.extract_strided_slice %39 {offsets = [7, 0], sizes = [1, 256], strides = [1, 1]} : vector<32x256xf32> to vector<1x256xf32>
    %89 = vector.broadcast %87 : vector<3x1xf32> to vector<3x256xf32>
    %90 = vector.broadcast %88 : vector<1x256xf32> to vector<3x256xf32>
    %91 = arith.mulf %89, %90 : vector<3x256xf32>
    %92 = arith.addf %86, %91 : vector<3x256xf32>
    %93 = vector.extract_strided_slice %40 {offsets = [0, 8], sizes = [3, 1], strides = [1, 1]} : vector<3x32xf32> to vector<3x1xf32>
    %94 = vector.extract_strided_slice %39 {offsets = [8, 0], sizes = [1, 256], strides = [1, 1]} : vector<32x256xf32> to vector<1x256xf32>
    %95 = vector.broadcast %93 : vector<3x1xf32> to vector<3x256xf32>
    %96 = vector.broadcast %94 : vector<1x256xf32> to vector<3x256xf32>
    %97 = arith.mulf %95, %96 : vector<3x256xf32>
    %98 = arith.addf %92, %97 : vector<3x256xf32>
    %99 = vector.extract_strided_slice %40 {offsets = [0, 9], sizes = [3, 1], strides = [1, 1]} : vector<3x32xf32> to vector<3x1xf32>
    %100 = vector.extract_strided_slice %39 {offsets = [9, 0], sizes = [1, 256], strides = [1, 1]} : vector<32x256xf32> to vector<1x256xf32>
    %101 = vector.broadcast %99 : vector<3x1xf32> to vector<3x256xf32>
    %102 = vector.broadcast %100 : vector<1x256xf32> to vector<3x256xf32>
    %103 = arith.mulf %101, %102 : vector<3x256xf32>
    %104 = arith.addf %98, %103 : vector<3x256xf32>
    %105 = vector.extract_strided_slice %40 {offsets = [0, 10], sizes = [3, 1], strides = [1, 1]} : vector<3x32xf32> to vector<3x1xf32>
    %106 = vector.extract_strided_slice %39 {offsets = [10, 0], sizes = [1, 256], strides = [1, 1]} : vector<32x256xf32> to vector<1x256xf32>
    %107 = vector.broadcast %105 : vector<3x1xf32> to vector<3x256xf32>
    %108 = vector.broadcast %106 : vector<1x256xf32> to vector<3x256xf32>
    %109 = arith.mulf %107, %108 : vector<3x256xf32>
    %110 = arith.addf %104, %109 : vector<3x256xf32>
    %111 = vector.extract_strided_slice %40 {offsets = [0, 11], sizes = [3, 1], strides = [1, 1]} : vector<3x32xf32> to vector<3x1xf32>
    %112 = vector.extract_strided_slice %39 {offsets = [11, 0], sizes = [1, 256], strides = [1, 1]} : vector<32x256xf32> to vector<1x256xf32>
    %113 = vector.broadcast %111 : vector<3x1xf32> to vector<3x256xf32>
    %114 = vector.broadcast %112 : vector<1x256xf32> to vector<3x256xf32>
    %115 = arith.mulf %113, %114 : vector<3x256xf32>
    %116 = arith.addf %110, %115 : vector<3x256xf32>
    %117 = vector.extract_strided_slice %40 {offsets = [0, 12], sizes = [3, 1], strides = [1, 1]} : vector<3x32xf32> to vector<3x1xf32>
    %118 = vector.extract_strided_slice %39 {offsets = [12, 0], sizes = [1, 256], strides = [1, 1]} : vector<32x256xf32> to vector<1x256xf32>
    %119 = vector.broadcast %117 : vector<3x1xf32> to vector<3x256xf32>
    %120 = vector.broadcast %118 : vector<1x256xf32> to vector<3x256xf32>
    %121 = arith.mulf %119, %120 : vector<3x256xf32>
    %122 = arith.addf %116, %121 : vector<3x256xf32>
    %123 = vector.extract_strided_slice %40 {offsets = [0, 13], sizes = [3, 1], strides = [1, 1]} : vector<3x32xf32> to vector<3x1xf32>
    %124 = vector.extract_strided_slice %39 {offsets = [13, 0], sizes = [1, 256], strides = [1, 1]} : vector<32x256xf32> to vector<1x256xf32>
    %125 = vector.broadcast %123 : vector<3x1xf32> to vector<3x256xf32>
    %126 = vector.broadcast %124 : vector<1x256xf32> to vector<3x256xf32>
    %127 = arith.mulf %125, %126 : vector<3x256xf32>
    %128 = arith.addf %122, %127 : vector<3x256xf32>
    %129 = vector.extract_strided_slice %40 {offsets = [0, 14], sizes = [3, 1], strides = [1, 1]} : vector<3x32xf32> to vector<3x1xf32>
    %130 = vector.extract_strided_slice %39 {offsets = [14, 0], sizes = [1, 256], strides = [1, 1]} : vector<32x256xf32> to vector<1x256xf32>
    %131 = vector.broadcast %129 : vector<3x1xf32> to vector<3x256xf32>
    %132 = vector.broadcast %130 : vector<1x256xf32> to vector<3x256xf32>
    %133 = arith.mulf %131, %132 : vector<3x256xf32>
    %134 = arith.addf %128, %133 : vector<3x256xf32>
    %135 = vector.extract_strided_slice %40 {offsets = [0, 15], sizes = [3, 1], strides = [1, 1]} : vector<3x32xf32> to vector<3x1xf32>
    %136 = vector.extract_strided_slice %39 {offsets = [15, 0], sizes = [1, 256], strides = [1, 1]} : vector<32x256xf32> to vector<1x256xf32>
    %137 = vector.broadcast %135 : vector<3x1xf32> to vector<3x256xf32>
    %138 = vector.broadcast %136 : vector<1x256xf32> to vector<3x256xf32>
    %139 = arith.mulf %137, %138 : vector<3x256xf32>
    %140 = arith.addf %134, %139 : vector<3x256xf32>
    %141 = vector.extract_strided_slice %40 {offsets = [0, 16], sizes = [3, 1], strides = [1, 1]} : vector<3x32xf32> to vector<3x1xf32>
    %142 = vector.extract_strided_slice %39 {offsets = [16, 0], sizes = [1, 256], strides = [1, 1]} : vector<32x256xf32> to vector<1x256xf32>
    %143 = vector.broadcast %141 : vector<3x1xf32> to vector<3x256xf32>
    %144 = vector.broadcast %142 : vector<1x256xf32> to vector<3x256xf32>
    %145 = arith.mulf %143, %144 : vector<3x256xf32>
    %146 = arith.addf %140, %145 : vector<3x256xf32>
    %147 = vector.extract_strided_slice %40 {offsets = [0, 17], sizes = [3, 1], strides = [1, 1]} : vector<3x32xf32> to vector<3x1xf32>
    %148 = vector.extract_strided_slice %39 {offsets = [17, 0], sizes = [1, 256], strides = [1, 1]} : vector<32x256xf32> to vector<1x256xf32>
    %149 = vector.broadcast %147 : vector<3x1xf32> to vector<3x256xf32>
    %150 = vector.broadcast %148 : vector<1x256xf32> to vector<3x256xf32>
    %151 = arith.mulf %149, %150 : vector<3x256xf32>
    %152 = arith.addf %146, %151 : vector<3x256xf32>
    %153 = vector.extract_strided_slice %40 {offsets = [0, 18], sizes = [3, 1], strides = [1, 1]} : vector<3x32xf32> to vector<3x1xf32>
    %154 = vector.extract_strided_slice %39 {offsets = [18, 0], sizes = [1, 256], strides = [1, 1]} : vector<32x256xf32> to vector<1x256xf32>
    %155 = vector.broadcast %153 : vector<3x1xf32> to vector<3x256xf32>
    %156 = vector.broadcast %154 : vector<1x256xf32> to vector<3x256xf32>
    %157 = arith.mulf %155, %156 : vector<3x256xf32>
    %158 = arith.addf %152, %157 : vector<3x256xf32>
    %159 = vector.extract_strided_slice %40 {offsets = [0, 19], sizes = [3, 1], strides = [1, 1]} : vector<3x32xf32> to vector<3x1xf32>
    %160 = vector.extract_strided_slice %39 {offsets = [19, 0], sizes = [1, 256], strides = [1, 1]} : vector<32x256xf32> to vector<1x256xf32>
    %161 = vector.broadcast %159 : vector<3x1xf32> to vector<3x256xf32>
    %162 = vector.broadcast %160 : vector<1x256xf32> to vector<3x256xf32>
    %163 = arith.mulf %161, %162 : vector<3x256xf32>
    %164 = arith.addf %158, %163 : vector<3x256xf32>
    %165 = vector.extract_strided_slice %40 {offsets = [0, 20], sizes = [3, 1], strides = [1, 1]} : vector<3x32xf32> to vector<3x1xf32>
    %166 = vector.extract_strided_slice %39 {offsets = [20, 0], sizes = [1, 256], strides = [1, 1]} : vector<32x256xf32> to vector<1x256xf32>
    %167 = vector.broadcast %165 : vector<3x1xf32> to vector<3x256xf32>
    %168 = vector.broadcast %166 : vector<1x256xf32> to vector<3x256xf32>
    %169 = arith.mulf %167, %168 : vector<3x256xf32>
    %170 = arith.addf %164, %169 : vector<3x256xf32>
    %171 = vector.extract_strided_slice %40 {offsets = [0, 21], sizes = [3, 1], strides = [1, 1]} : vector<3x32xf32> to vector<3x1xf32>
    %172 = vector.extract_strided_slice %39 {offsets = [21, 0], sizes = [1, 256], strides = [1, 1]} : vector<32x256xf32> to vector<1x256xf32>
    %173 = vector.broadcast %171 : vector<3x1xf32> to vector<3x256xf32>
    %174 = vector.broadcast %172 : vector<1x256xf32> to vector<3x256xf32>
    %175 = arith.mulf %173, %174 : vector<3x256xf32>
    %176 = arith.addf %170, %175 : vector<3x256xf32>
    %177 = vector.extract_strided_slice %40 {offsets = [0, 22], sizes = [3, 1], strides = [1, 1]} : vector<3x32xf32> to vector<3x1xf32>
    %178 = vector.extract_strided_slice %39 {offsets = [22, 0], sizes = [1, 256], strides = [1, 1]} : vector<32x256xf32> to vector<1x256xf32>
    %179 = vector.broadcast %177 : vector<3x1xf32> to vector<3x256xf32>
    %180 = vector.broadcast %178 : vector<1x256xf32> to vector<3x256xf32>
    %181 = arith.mulf %179, %180 : vector<3x256xf32>
    %182 = arith.addf %176, %181 : vector<3x256xf32>
    %183 = vector.extract_strided_slice %40 {offsets = [0, 23], sizes = [3, 1], strides = [1, 1]} : vector<3x32xf32> to vector<3x1xf32>
    %184 = vector.extract_strided_slice %39 {offsets = [23, 0], sizes = [1, 256], strides = [1, 1]} : vector<32x256xf32> to vector<1x256xf32>
    %185 = vector.broadcast %183 : vector<3x1xf32> to vector<3x256xf32>
    %186 = vector.broadcast %184 : vector<1x256xf32> to vector<3x256xf32>
    %187 = arith.mulf %185, %186 : vector<3x256xf32>
    %188 = arith.addf %182, %187 : vector<3x256xf32>
    %189 = vector.extract_strided_slice %40 {offsets = [0, 24], sizes = [3, 1], strides = [1, 1]} : vector<3x32xf32> to vector<3x1xf32>
    %190 = vector.extract_strided_slice %39 {offsets = [24, 0], sizes = [1, 256], strides = [1, 1]} : vector<32x256xf32> to vector<1x256xf32>
    %191 = vector.broadcast %189 : vector<3x1xf32> to vector<3x256xf32>
    %192 = vector.broadcast %190 : vector<1x256xf32> to vector<3x256xf32>
    %193 = arith.mulf %191, %192 : vector<3x256xf32>
    %194 = arith.addf %188, %193 : vector<3x256xf32>
    %195 = vector.extract_strided_slice %40 {offsets = [0, 25], sizes = [3, 1], strides = [1, 1]} : vector<3x32xf32> to vector<3x1xf32>
    %196 = vector.extract_strided_slice %39 {offsets = [25, 0], sizes = [1, 256], strides = [1, 1]} : vector<32x256xf32> to vector<1x256xf32>
    %197 = vector.broadcast %195 : vector<3x1xf32> to vector<3x256xf32>
    %198 = vector.broadcast %196 : vector<1x256xf32> to vector<3x256xf32>
    %199 = arith.mulf %197, %198 : vector<3x256xf32>
    %200 = arith.addf %194, %199 : vector<3x256xf32>
    %201 = vector.extract_strided_slice %40 {offsets = [0, 26], sizes = [3, 1], strides = [1, 1]} : vector<3x32xf32> to vector<3x1xf32>
    %202 = vector.extract_strided_slice %39 {offsets = [26, 0], sizes = [1, 256], strides = [1, 1]} : vector<32x256xf32> to vector<1x256xf32>
    %203 = vector.broadcast %201 : vector<3x1xf32> to vector<3x256xf32>
    %204 = vector.broadcast %202 : vector<1x256xf32> to vector<3x256xf32>
    %205 = arith.mulf %203, %204 : vector<3x256xf32>
    %206 = arith.addf %200, %205 : vector<3x256xf32>
    %207 = vector.extract_strided_slice %40 {offsets = [0, 27], sizes = [3, 1], strides = [1, 1]} : vector<3x32xf32> to vector<3x1xf32>
    %208 = vector.extract_strided_slice %39 {offsets = [27, 0], sizes = [1, 256], strides = [1, 1]} : vector<32x256xf32> to vector<1x256xf32>
    %209 = vector.broadcast %207 : vector<3x1xf32> to vector<3x256xf32>
    %210 = vector.broadcast %208 : vector<1x256xf32> to vector<3x256xf32>
    %211 = arith.mulf %209, %210 : vector<3x256xf32>
    %212 = arith.addf %206, %211 : vector<3x256xf32>
    %213 = vector.extract_strided_slice %40 {offsets = [0, 28], sizes = [3, 1], strides = [1, 1]} : vector<3x32xf32> to vector<3x1xf32>
    %214 = vector.extract_strided_slice %39 {offsets = [28, 0], sizes = [1, 256], strides = [1, 1]} : vector<32x256xf32> to vector<1x256xf32>
    %215 = vector.broadcast %213 : vector<3x1xf32> to vector<3x256xf32>
    %216 = vector.broadcast %214 : vector<1x256xf32> to vector<3x256xf32>
    %217 = arith.mulf %215, %216 : vector<3x256xf32>
    %218 = arith.addf %212, %217 : vector<3x256xf32>
    %219 = vector.extract_strided_slice %40 {offsets = [0, 29], sizes = [3, 1], strides = [1, 1]} : vector<3x32xf32> to vector<3x1xf32>
    %220 = vector.extract_strided_slice %39 {offsets = [29, 0], sizes = [1, 256], strides = [1, 1]} : vector<32x256xf32> to vector<1x256xf32>
    %221 = vector.broadcast %219 : vector<3x1xf32> to vector<3x256xf32>
    %222 = vector.broadcast %220 : vector<1x256xf32> to vector<3x256xf32>
    %223 = arith.mulf %221, %222 : vector<3x256xf32>
    %224 = arith.addf %218, %223 : vector<3x256xf32>
    %225 = vector.extract_strided_slice %40 {offsets = [0, 30], sizes = [3, 1], strides = [1, 1]} : vector<3x32xf32> to vector<3x1xf32>
    %226 = vector.extract_strided_slice %39 {offsets = [30, 0], sizes = [1, 256], strides = [1, 1]} : vector<32x256xf32> to vector<1x256xf32>
    %227 = vector.broadcast %225 : vector<3x1xf32> to vector<3x256xf32>
    %228 = vector.broadcast %226 : vector<1x256xf32> to vector<3x256xf32>
    %229 = arith.mulf %227, %228 : vector<3x256xf32>
    %230 = arith.addf %224, %229 : vector<3x256xf32>
    %231 = vector.extract_strided_slice %40 {offsets = [0, 31], sizes = [3, 1], strides = [1, 1]} : vector<3x32xf32> to vector<3x1xf32>
    %232 = vector.extract_strided_slice %39 {offsets = [31, 0], sizes = [1, 256], strides = [1, 1]} : vector<32x256xf32> to vector<1x256xf32>
    %233 = vector.broadcast %231 : vector<3x1xf32> to vector<3x256xf32>
    %234 = vector.broadcast %232 : vector<1x256xf32> to vector<3x256xf32>
    %235 = arith.mulf %233, %234 : vector<3x256xf32>
    %236 = arith.addf %230, %235 : vector<3x256xf32>
    %c0_24 = arith.constant 0 : index
    %c0_25 = arith.constant 0 : index
    %237 = vector.load %arg6[%c0_24, %c0_25] : memref<3x256xf32, #tpu.memory_space<vmem>>, vector<3x256xf32>
    tpu.vector_store %arg6[%c0_24, %c0_25], %236 {strides = array<i32>} : memref<3x256xf32, #tpu.memory_space<vmem>>, vector<3x256xf32>,
    return
  }
  func.func @transform_0(%arg0: i32) -> (i32, i32) {
    %c0_i32 = arith.constant 0 : i32
    %c0_i32_0 = arith.constant 0 : i32
    return %c0_i32, %arg0 : i32, i32
  }
  func.func @transform_1(%arg0: i32) -> (i32, i32) {
    %c0_i32 = arith.constant 0 : i32
    %c0_i32_0 = arith.constant 0 : i32
    %c0_i32_1 = arith.constant 0 : i32
    return %c0_i32, %c0_i32_0 : i32, i32
  }
  func.func @transform_2(%arg0: i32) -> (i32, i32, i32) {
    %c0_i32 = arith.constant 0 : i32
    %c0_i32_0 = arith.constant 0 : i32
    %c0_i32_1 = arith.constant 0 : i32
    %c0_i32_2 = arith.constant 0 : i32
    return %c0_i32, %c0_i32_0, %c0_i32_1 : i32, i32, i32
  }
  func.func @transform_3(%arg0: i32) -> (i32, i32) {
    %c0_i32 = arith.constant 0 : i32
    %c0_i32_0 = arith.constant 0 : i32
    %c0_i32_1 = arith.constant 0 : i32
    return %c0_i32, %c0_i32_0 : i32, i32
  }
  func.func @transform_4(%arg0: i32) -> (i32, i32, i32) {
    %c0_i32 = arith.constant 0 : i32
    %c0_i32_0 = arith.constant 0 : i32
    %c0_i32_1 = arith.constant 0 : i32
    %c0_i32_2 = arith.constant 0 : i32
    return %c0_i32, %c0_i32_0, %c0_i32_1 : i32, i32, i32
  }
  func.func @transform_5(%arg0: i32) -> (i32, i32) {
    %c0_i32 = arith.constant 0 : i32
    %c0_i32_0 = arith.constant 0 : i32
    return %c0_i32, %arg0 : i32, i32
  }
}

</mosaic_0001>

<bundles_post_ra>
// kernel: rf_base_forward.1
= control target key start
LH: loop header
LB: loop body
LE: loop exit
PB: predicated region body
PF: predicated region fallthrough
CT: control target
= control target key end

     0   :  { %10 = vsyncpa [#allocation3], 0  ;;  %s1926_s0 = inlined_call_operand.vmem [shape: f32[2,1024], index: 0, kind: input, shape index: {}]   ;;  %s1927_s1 = inlined_call_operand.vmem [shape: f32[32,2], index: 1, kind: input, shape index: {}]   ;;  %s1928_s2 = inlined_call_operand.vmem [shape: bf16[2,32,32], index: 2, kind: input, shape index: {}]   ;;  %s1929_s3 = inlined_call_operand.vmem [shape: f32[3,32], index: 3, kind: input, shape index: {}]   ;;  %s1930_s4 = inlined_call_operand.vmem [shape: f32[4,32,1], index: 4, kind: input, shape index: {}]   ;;  %s1931_s5 = inlined_call_operand.hbm [shape: f32[3,1024], index: 5, kind: output, shape index: {}]  }
   0x1   :  { %12 = vsyncpa [#allocation3 + $0x1], 0  ;;  %s1466_s18 = smov 0   ;;  %s1468_s19 = smov 0  }
   0x2   :  { %s1470_s20 = smov 0   ;;  %s1472_s21 = smov 0  }
   0x3 LB: > { %s1487_s22 = sadd.s32 4294967295, %s1401_s21   ;;  %s1191_s23 = sadd.s32 4294967294, %s1401_s21   ;;  %s1401_s21 = sphi %s1472_s21, %s1937_s21   ;;  %s1397_s20 = sphi %s1470_s20, %s1936_s20   ;;  %s1393_s19 = sphi %s1468_s19, %s1935_s19   ;;  %s1389_s18 = sphi %s1466_s18, %s1934_s18  }
   0x4   : > { %s1491_s24 = sadd.s32 1, %s1401_s21   ;;  %s135_s25 = sadd.s32 1, %s1397_s20 }
   0x5   : > { %s132_s26 = ssub.s32 %s1401_s21, %s1491_s24  ;;  %p145_p0 = scmp.ne.s32.totalorder %s1397_s20, %s1393_s19 }
   0x6   : > { %p133_p1 = scmp.eq.s32.totalorder %s132_s26, 0  ;;  %p146_p2 = scmp.eq.s32.totalorder %s1487_s22, 3 }
   0x7   : > { %p151_p3 = scmp.ne.s32.totalorder %s1393_s19, %s1389_s18  ;;  %p152_p4 = scmp.eq.s32.totalorder %s1191_s23, 3 }
   0x8   : > { %s1502_s27 = scalar_select %p133_p1, %s1397_s20, %s135_s25  }
   0x9   : > { %p1504_p5 = por %p146_p2, %p145_p0  ;;  %p1508_p6 = por %p152_p4, %p151_p3 }
   0xa   : > { %p1194_p7 = scmp.ge.s32.totalorder %s1401_s21, 1  ;;  %p191_p8 = scmp.lt.s32.totalorder %s1401_s21, 5 }
   0xc   : > { %p192_p9 = pnand %p1194_p7, %p191_p8 }
   0xd   : > { %v232_v0 = vld [vmem:[%s1930_s4] sm:$0xff] (!%p192_p9)  ;;  %v1403_v2 = vmov (!%p192_p9), 0   ;;  %v233_v3 = vld [vmem:[%s1930_s4 + $0x8] sm:$0xff] (!%p192_p9)  ;;  %v231_v5 = vld [vmem:[%s1927_s1 + $0x18] sm:$0xff] (!%p192_p9)  ;;  %v1404_v6 = vmov (!%p192_p9), 1   ;;  %s1196_s9 = sshll.u32 (!%p192_p9), %s1487_s22, 1  ;;  %v277_v20 = vlaneseq (!%p192_p9) }
   0xe   : > { %195 = sbr.rel (%p192_p9) target bundleno = 716 (0x2cc), region = 40  ;;  %v228_v1 = vld [vmem:[%s1927_s1] sm:$0xff] (!%p192_p9)  ;;  %1297 = vset.pattern.permute.xlu1 (!%p192_p9), %v1403_v2  ;;  %1296 = vset.pattern.permute.xlu0 (!%p192_p9), %v1403_v2  ;;  %v229_v4 = vld [vmem:[%s1927_s1 + $0x8] sm:$0xff] (!%p192_p9)  ;;  %v230_v7 = vld [vmem:[%s1927_s1 + $0x10] sm:$0xff] (!%p192_p9)  ;;  %p220_p10 = scmp.lt.s32.totalorder (!%p192_p9), %s1196_s9, 7  ;;  %vm412_vm0 = vcmask (!%p192_p9), 261120  }
   0xf   : > { %238 = vperm.xlu1 (!%p192_p9), %1297, %v232_v0   ;;  %258 = vperm.xlu0 (!%p192_p9), %1296, %v228_v1   ;;  %v234_v8 = vld [vmem:[%s1930_s4 + $0x10] sm:$0xff] (!%p192_p9)  ;;  %v235_v9 = vld [vmem:[%s1930_s4 + $0x18] sm:$0xff] (!%p192_p9)  ;;  %v1198_v10 = vld [vmem:[%s1930_s4 + $0x20] sm:$0xff] (!%p192_p9)  ;;  %v1580_v21 = vshrl.u32 (!%p192_p9), %v277_v20, 7  ;;  %s216_s6 = sand.u32 (!%p192_p9), 1, %s1393_s19   ;;  %s1224_s8 = sshll.u32 (!%p192_p9), %s1487_s22, 7 }
  0x10   : > { %451 = vmatprep.mubr.bf16.mxu0 (!%p192_p9), %v1403_v2  ;;  %562 = vmatprep.mubr.bf16.mxu1 (!%p192_p9), %v1403_v2  ;;  %v1199_v11 = vld [vmem:[%s1930_s4 + $0x28] sm:$0xff] (!%p192_p9)  ;;  %v1200_v12 = vld [vmem:[%s1930_s4 + $0x30] sm:$0xff] (!%p192_p9)  ;;  %v1210_v13 = vld [vmem:[%s1930_s4 + $0x40] sm:$0xff] (!%p192_p9)  ;;  %s1195_s7 = sshll.u32 (!%p192_p9), %s216_s6, 3  ;;  %s1118_s14 = scalar_lea.sflag (!%p192_p9), [#allocation3], %s216_s6 }
  0x11   : > { %v1201_v14 = vld [vmem:[%s1930_s4 + $0x38] sm:$0xff] (!%p192_p9)  ;;  %v1212_v15 = vld [vmem:[%s1930_s4 + $0x50] sm:$0xff] (!%p192_p9)  ;;  %v1211_v16 = vld [vmem:[%s1930_s4 + $0x48] sm:$0xff] (!%p192_p9)  ;;  %v1586_v22 = vsub.s32 (!%p192_p9), 0, %v1580_v21  ;;  %v1589_v23 = vsub.s32 (!%p192_p9), 2, %v1580_v21  ;;  %v1592_v25 = vsub.s32 (!%p192_p9), 1, %v1580_v21 }
  0x12   : > { %v1569_v17 = vld [vmem:[%s1929_s3] sm:$0x7] (!%p192_p9)  ;;  %v1213_v18 = vld [vmem:[%s1930_s4 + $0x58] sm:$0xff] (!%p192_p9)  ;;  %v1595_v26 = vsub.s32 (!%p192_p9), 3, %v1580_v21  ;;  %s1435_s22 = smov (!%p192_p9), [#allocation2]  }
  0x13   : > { %243 = vperm.xlu1 (!%p192_p9), %1297, %v233_v3   ;;  %263 = vperm.xlu0 (!%p192_p9), %1296, %v229_v4   ;;  %v1218_v19 = vld [vmem:[%s1930_s4 + $0x60] sm:$0x7] (!%p192_p9)  ;;  %s1343_s16 = sshll.u32 (!%p192_p9), %s1435_s22, 4  ;;  %s1344_s16 = int_to_ptr.vmem [resolvable:$false] %s1343_s16 }
  0x14   : > { %s1345_s17 = scalar_lea.vmem (!%p192_p9), %s1344_s16, 256 }
  0x15   : > { %s1939_s9 = smov (!%p220_p10, %s1196_s9), 7 }
  0x16   : > { %s1197_s10 = sshll.u32 %s1939_s9, 1  ;;  %s218_s9 = scalar_lea.vmem [#allocation2], %s1195_s7 }
  0x17   : > { %1298 = vset.pattern.permute.xlu1 %v1404_v6  ;;  %273 = vperm.xlu0 %1296, %v231_v5   ;;  %s223_s13 = scalar_lea.vmem %s1926_s0, %s1197_s10  ;;  %s1132_s10 = sshll.u32 %s218_s9, 4  ;;  %s1886_s10 = int_to_ptr.vmem [resolvable:$true] %s1132_s10 }
  0x18   : > { %316 = vperm.xlu1 %1298, %v229_v4   ;;  %v227_v24 = vld [vmem:[%s223_s13] sm:$0xf]  ;;  %s1884_s13 = scalar_lea.hbm %s1931_s5, %s1224_s8  ;;  %s1339_s15 = scalar_lea.vmem %s1886_s10, 128 }
  0x19   : > { %v280_v29 = vrot.slane %v227_v24, %v1586_v22  ;;  %v284_v30 = vrot.slane %v227_v24, %v1589_v23  ;;  %v330_v31 = vrot.slane %v227_v24, %v1592_v25  ;;  %v334_v32 = vrot.slane %v227_v24, %v1595_v26  ;;  %p1340_p11 = scmp.ne.s32.totalorder %s1886_s10, %s1339_s15  ;;  %p1346_p0 = scmp.lt.s32.totalorder %s1886_s10, %s1344_s16 }
  0x1a   : > { %p1347_p1 = scmp.lt.s32.totalorder %s1345_s17, %s1339_s15 }
  0x1b   : > { %1300 = vset.pattern.permute.xlu0 %v1404_v6  ;;  %v290_v35 = vrot.slane %v280_v29, %v1586_v22  ;;  %v294_v36 = vrot.slane %v284_v30, %v1586_v22  ;;  %v340_v37 = vrot.slane %v330_v31, %v1592_v25  ;;  %v344_v38 = vrot.slane %v334_v32, %v1592_v25  ;;  %p1341_p12 = pnand %p1340_p11, %p1504_p5 }
  0x1c   : > { %1299 = vset.pattern.permute.xlu1 %v1403_v2  ;;  %312 = vperm.xlu0 %1300, %v228_v1   ;;  %p1348_p2 = por %p1347_p1, %p1346_p0 }
  0x1d   : > { %268 = vperm.xlu1 %1299, %v230_v7   ;;  %p1342_p13 = pneg %p1341_p12 }
  0x1f   : > { %p1349_p3 = pnand %p1348_p2, %p1342_p13 }
  0x20   : > { %320 = vperm.xlu0 %1300, %v230_v7  }
  0x21   : > { %248 = vperm.xlu1 %1299, %v234_v8  }
  0x24   : > { %1303 = vset.pattern.permute.xlu0 %v1403_v2 }
  0x25   : > { %253 = vperm.xlu1 %1299, %v235_v9   ;;  %389 = vperm.xlu0 %1303, %v1199_v11  }
  0x29   : > { %1301 = vset.pattern.permute.xlu1 %v1404_v6  ;;  %496 = vperm.xlu0 %1303, %v1210_v13  }
  0x2a   : > { %324 = vperm.xlu1 %1301, %v231_v5  }
  0x2d   : > { %506 = vperm.xlu0 %1303, %v1212_v15  }
  0x2e   : > { %1302 = vset.pattern.permute.xlu1 %v1403_v2 }
  0x2f   : > { %384 = vperm.xlu1 %1302, %v1198_v10  }
  0x31   : > { %601 = vperm.xlu0 %1303, %v1569_v17  }
  0x33   : > { %394 = vperm.xlu1 %1302, %v1200_v12  }
  0x35   : > { %1304 = vset.pattern.permute.xlu0 %v1404_v6 }
  0x36   : > { %617 = vperm.xlu0 %1304, %v1569_v17  }
  0x37   : > { %399 = vperm.xlu1 %1302, %v1201_v14  }
  0x3b   : > { %501 = vperm.xlu1 %1302, %v1211_v16  }
  0x3f   : > { %511 = vperm.xlu1 %1302, %v1213_v18  }
  0x43   : > { %596 = vperm.xlu1 %1302, %v1218_v19  }
  0x8e   : > { %v239_v27 = vpop.permute.xlu1 %238  ;;  %v259_v28 = vpop.permute.xlu0 %258 }
  0x8f   : > { %v295_v42 = vmul.f32 %v290_v35, %v259_v28  ;;  %v296_v43 = vmul.f32 %v294_v36, %v259_v28 }
  0x91   : > { %v303_v49 = vadd.f32 %v295_v42, %v239_v27  ;;  %v304_v50 = vadd.f32 %v296_v43, %v239_v27  ;;  %v1411_v42 = vmov 10   ;;  %v1412_v43 = vmov 8  }
  0x92   : > { %v244_v33 = vpop.permute.xlu1 %243  ;;  %v264_v34 = vpop.permute.xlu0 %263 }
  0x93   : > { %v297_v39 = vmul.f32 %v290_v35, %v264_v34  ;;  %v298_v40 = vmul.f32 %v294_v36, %v264_v34  ;;  %v1335_v34 = vld [vmem:[%s1928_s2] sm:$0xff]  }
  0x95   : > { %v305_v47 = vadd.f32 %v297_v39, %v244_v33  ;;  %v306_v48 = vadd.f32 %v298_v40, %v244_v33  ;;  %v1408_v39 = vmov 5   ;;  %v1409_v40 = vmov 7  }
  0x96   : > { %v274_v41 = vpop.permute.xlu0 %273 }
  0x97   : > { %v317_v44 = vpop.permute.xlu1 %316  ;;  %v301_v11 = vmul.f32 %v290_v35, %v274_v41  ;;  %v302_v12 = vmul.f32 %v294_v36, %v274_v41  ;;  %v1410_v41 = vmov 6  }
  0x98   : > { %v347_v45 = vmul.f32 %v340_v37, %v317_v44  ;;  %v348_v46 = vmul.f32 %v344_v38, %v317_v44  ;;  %v1413_v44 = vmov 13  }
  0x9a   : > { %v355_v52 = vadd.f32 %v347_v45, %v305_v47  ;;  %v356_v56 = vadd.f32 %v348_v46, %v306_v48  ;;  %v1414_v45 = vmov 9   ;;  %v1415_v46 = vmov 16  }
  0x9b   : > { %v313_v51 = vpop.permute.xlu0 %312  ;;  %v1416_v47 = vmov 11   ;;  %v1417_v48 = vmov 19  }
  0x9c   : > { %v345_v53 = vmul.f32 %v340_v37, %v313_v51  ;;  %v346_v54 = vmul.f32 %v344_v38, %v313_v51  ;;  %v269_v55 = vpop.permute.xlu1 %268  ;;  %v364_v61 = vmax.f32 %v356_v56, 0.0  ;;  %v363_v63 = vmax.f32 %v355_v52, 0.0 }
  0x9d   : > { %v299_v4 = vmul.f32 %v290_v35, %v269_v55  ;;  %v300_v5 = vmul.f32 %v294_v36, %v269_v55  ;;  %v1336_v35 = vld [vmem:[%s1928_s2 + $0x8] sm:$0xff]   ;;  %v1405_v36 = vmov 2   ;;  %v1420_v51 = vmov 14  }
  0x9e   : > { %v353_v57 = vadd.f32 %v345_v53, %v303_v49  ;;  %v354_v58 = vadd.f32 %v346_v54, %v304_v50  ;;  %1305 = vset.pattern.permute.xlu1 %v1405_v36  ;;  %v1418_v49 = vmov 12   ;;  %v1419_v50 = vmov 22  }
  0x9f   : > { %v321_v0 = vpop.permute.xlu0 %320  ;;  %633 = vperm.xlu1 %1305, %v1569_v17   ;;  %v1421_v52 = vmov 25   ;;  %v1422_v53 = vmov 15   ;;  %v1423_v54 = vmov 28   ;;  %v1424_v55 = vmov 17  }
  0xa0   : > { %v249_v59 = vpop.permute.xlu1 %248  ;;  %v362_v60 = vmax.f32 %v354_v58, 0.0  ;;  %v361_v62 = vmax.f32 %v353_v57, 0.0  ;;  %v349_v9 = vmul.f32 %v340_v37, %v321_v0  ;;  %v350_v10 = vmul.f32 %v344_v38, %v321_v0 }
  0xa1   : > { %v307_v7 = vadd.f32 %v299_v4, %v249_v59  ;;  %v308_v8 = vadd.f32 %v300_v5, %v249_v59  ;;  %v1425_v56 = vmov 31   ;;  %v1426_v57 = vmov 18  }
  0xa2   : > { %v374_v1 = vpack.c.bf16 %v364_v61, %v362_v60  ;;  %v373_v3 = vpack.c.bf16 %v363_v63, %v361_v62  ;;  %v1427_v58 = vmov 20   ;;  %v1428_v59 = vmov 21  }
  0xa3   : > { %v357_v13 = vadd.f32 %v349_v9, %v307_v7  ;;  %v358_v14 = vadd.f32 %v350_v10, %v308_v8  ;;  %v1429_v60 = vmov 23   ;;  %v1430_v61 = vmov 24  }
  0xa4   : > { %v254_v6 = vpop.permute.xlu1 %253  ;;  %419 = vmatprep.subr.bf16.mxu0 %v374_v1  ;;  %v1431_v62 = vmov 26   ;;  %v1432_v63 = vmov 27   ;;  %v1433_v0 = vmov 29   ;;  %v1434_v1 = vmov 30   ;;  %v390_v7 = vpop.permute.xlu0 %389 }
  0xa5   : > { %420 = vmatpush1.bf16.msra.mxu0 %v373_v3  ;;  %v309_v16 = vadd.f32 %v301_v11, %v254_v6  ;;  %v310_v18 = vadd.f32 %v302_v12, %v254_v6  ;;  %v365_v28 = vmax.f32 %v357_v13, 0.0  ;;  %v366_v29 = vmax.f32 %v358_v14, 0.0 }
  0xa9   : > { %v325_v15 = vpop.permute.xlu1 %324 }
  0xaa   : > { %v351_v19 = vmul.f32 %v340_v37, %v325_v15  ;;  %v352_v20 = vmul.f32 %v344_v38, %v325_v15  ;;  %v1406_v37 = vmov 3   ;;  %v1407_v38 = vmov 4  }
  0xab   : > { %1306 = vset.pattern.permute.xlu1 %v1406_v37  ;;  %1307 = vset.pattern.permute.xlu0 %v1407_v38 }
  0xac   : > { %v359_v24 = vadd.f32 %v351_v19, %v309_v16  ;;  %v360_v27 = vadd.f32 %v352_v20, %v310_v18  ;;  %649 = vperm.xlu1 %1306, %v1569_v17   ;;  %665 = vperm.xlu0 %1307, %v1569_v17  }
  0xae   : > { %v367_v30 = vmax.f32 %v359_v24, 0.0  ;;  %v368_v31 = vmax.f32 %v360_v27, 0.0  ;;  %v385_v3 = vpop.permute.xlu1 %384 }
  0xb0   : > { %v376_v32 = vpack.c.bf16 %v368_v31, %v366_v29  ;;  %v375_v33 = vpack.c.bf16 %v367_v30, %v365_v28  ;;  %1308 = vset.pattern.permute.xlu1 %v1408_v39  ;;  %1310 = vset.pattern.permute.xlu0 %v1409_v40  ;;  %v1337_v40 = vld [vmem:[%s1928_s2 + $0x10] sm:$0xff]  }
  0xb1   : > { %681 = vperm.xlu1 %1308, %v1569_v17   ;;  %713 = vperm.xlu0 %1310, %v1569_v17  }
  0xb2   : > { %421 = vmatprep.subr.bf16.mxu0 %v376_v32  ;;  %v395_v12 = vpop.permute.xlu1 %394 }
  0xb3   : > { %422 = vmatpush1.bf16.msra.mxu0 %v375_v33 }
  0xb5   : > { %1309 = vset.pattern.permute.xlu1 %v1410_v41  ;;  %1313 = vset.pattern.permute.xlu0 %v1411_v42  ;;  %v1338_v41 = vld [vmem:[%s1928_s2 + $0x18] sm:$0xff]  }
  0xb6   : > { %1204 = vmatmul.mubr.msk.bf16.vlgmr.msra.gmra.mrb[0].mxu0 %vm412_vm0, %v1335_v34  ;;  %697 = vperm.xlu1 %1309, %v1569_v17   ;;  %v400_v28 = vpop.permute.xlu1 %399 }
  0xb7   : > { %461 = vmatprep.mubr.bf16.mxu0 %v1403_v2  ;;  %761 = vperm.xlu0 %1313, %v1569_v17  }
  0xba   : > { %1311 = vset.pattern.permute.xlu1 %v1412_v43  ;;  %v502_v42 = vpop.permute.xlu1 %501 }
  0xbb   : > { %729 = vperm.xlu1 %1311, %v1569_v17   ;;  %1316 = vset.pattern.permute.xlu0 %v1413_v44 }
  0xbc   : > { %809 = vperm.xlu0 %1316, %v1569_v17  }
  0xbe   : > { %1205 = vmatmul.mubr.msk.bf16.gmra.mrb[4].mxu0 %vm412_vm0, %v1336_v35  ;;  %v1653_v43 = vpop.permute.xlu1 %511 }
  0xbf   : > { %1312 = vset.pattern.permute.xlu1 %v1414_v45 }
  0xc0   : > { %745 = vperm.xlu1 %1312, %v1569_v17   ;;  %1319 = vset.pattern.permute.xlu0 %v1415_v46 }
  0xc1   : > { %857 = vperm.xlu0 %1319, %v1569_v17  }
  0xc2   : > { %v597_v44 = vpop.permute.xlu1 %596 }
  0xc4   : > { %1314 = vset.pattern.permute.xlu1 %v1416_v47 }
  0xc5   : > { %777 = vperm.xlu1 %1314, %v1569_v17   ;;  %1322 = vset.pattern.permute.xlu0 %v1417_v48 }
  0xc6   : > { %905 = vperm.xlu0 %1322, %v1569_v17  }
  0xc9   : > { %1315 = vset.pattern.permute.xlu1 %v1418_v49 }
  0xca   : > { %793 = vperm.xlu1 %1315, %v1569_v17   ;;  %1325 = vset.pattern.permute.xlu0 %v1419_v50 }
  0xcb   : > { %953 = vperm.xlu0 %1325, %v1569_v17  }
  0xce   : > { %1317 = vset.pattern.permute.xlu1 %v1420_v51  ;;  %v497_v51 = vpop.permute.xlu0 %496 }
  0xcf   : > { %825 = vperm.xlu1 %1317, %v1569_v17   ;;  %1328 = vset.pattern.permute.xlu0 %v1421_v52 }
  0xd0   : > { %1001 = vperm.xlu0 %1328, %v1569_v17  }
  0xd3   : > { %1318 = vset.pattern.permute.xlu1 %v1422_v53  ;;  %v1669_v53 = vpop.permute.xlu0 %506 }
  0xd4   : > { %841 = vperm.xlu1 %1318, %v1569_v17   ;;  %1331 = vset.pattern.permute.xlu0 %v1423_v54 }
  0xd5   : > { %1049 = vperm.xlu0 %1331, %v1569_v17  }
  0xd8   : > { %1320 = vset.pattern.permute.xlu1 %v1424_v55 }
  0xd9   : > { %873 = vperm.xlu1 %1320, %v1569_v17   ;;  %1334 = vset.pattern.permute.xlu0 %v1425_v56 }
  0xda   : > { %1097 = vperm.xlu0 %1334, %v1569_v17  }
  0xdd   : > { %1321 = vset.pattern.permute.xlu1 %v1426_v57 }
  0xde   : > { %889 = vperm.xlu1 %1321, %v1569_v17  }
  0xe2   : > { %1323 = vset.pattern.permute.xlu1 %v1427_v58  ;;  %v602_v58 = vpop.permute.xlu0 %601 }
  0xe3   : > { %921 = vperm.xlu1 %1323, %v1569_v17  }
  0xe7   : > { %1324 = vset.pattern.permute.xlu1 %v1428_v59 }
  0xe8   : > { %937 = vperm.xlu1 %1324, %v1569_v17  }
  0xec   : > { %1326 = vset.pattern.permute.xlu1 %v1429_v60 }
  0xed   : > { %969 = vperm.xlu1 %1326, %v1569_v17  }
  0xf1   : > { %1327 = vset.pattern.permute.xlu1 %v1430_v61 }
  0xf2   : > { %985 = vperm.xlu1 %1327, %v1569_v17  }
  0xf6   : > { %1329 = vset.pattern.permute.xlu1 %v1431_v62 }
  0xf7   : > { %1017 = vperm.xlu1 %1329, %v1569_v17  }
  0xfb   : > { %1330 = vset.pattern.permute.xlu1 %v1432_v63 }
  0xfc   : > { %1033 = vperm.xlu1 %1330, %v1569_v17  }
 0x100   : > { %1332 = vset.pattern.permute.xlu1 %v1433_v0 }
 0x101   : > { %1065 = vperm.xlu1 %1332, %v1569_v17  }
 0x105   : > { %1333 = vset.pattern.permute.xlu1 %v1434_v1 }
 0x106   : > { %1081 = vperm.xlu1 %1333, %v1569_v17  }
 0x11e   : > { %v634_v45 = vpop.permute.xlu1 %633 }
 0x12b   : > { %v1655_v46 = vpop.permute.xlu1 %649 }
 0x130   : > { %v1657_v47 = vpop.permute.xlu1 %681 }
 0x135   : > { %v1659_v48 = vpop.permute.xlu1 %697 }
 0x13a   : > { %v1661_v49 = vpop.permute.xlu1 %729 }
 0x189   : > { %v453_v4 = vpop.f32.mrb[0].mxu0 }
 0x18a   : > { %v454_v5 = vadd.f32 %v453_v4, %v385_v3  ;;  %v455_v6 = vpop.f32.mrb[1].mxu0  ;;  %v618_v4 = vpop.permute.xlu0 %617 }
 0x18b   : > { %v456_v8 = vadd.f32 %v455_v6, %v385_v3  ;;  %v457_v9 = vpop.f32.mrb[2].mxu0 }
 0x18c   : > { %v458_v10 = vadd.f32 %v457_v9, %v390_v7  ;;  %v459_v11 = vpop.f32.mrb[3].mxu0  ;;  %v472_v14 = vmax.f32 %v454_v5, 0.0  ;;  %v1680_v5 = vsub.s32 4, %v1580_v21  ;;  %v1685_v9 = vsub.s32 5, %v1580_v21 }
 0x18d   : > { %v460_v13 = vadd.f32 %v459_v11, %v390_v7  ;;  %v473_v16 = vmax.f32 %v456_v8, 0.0 }
 0x18e   : > { %v474_v15 = vmax.f32 %v458_v10, 0.0 }
 0x18f   : > { %v475_v18 = vmax.f32 %v460_v13, 0.0 }
 0x190   : > { %v485_v19 = vpack.c.bf16 %v474_v15, %v472_v14 }
 0x191   : > { %v463_v20 = vpop.f32.mrb[4].mxu0  ;;  %v486_v24 = vpack.c.bf16 %v475_v18, %v473_v16 }
 0x192   : > { %v464_v27 = vadd.f32 %v463_v20, %v395_v12  ;;  %v465_v17 = vpop.f32.mrb[5].mxu0 }
 0x193   : > { %v466_v29 = vadd.f32 %v465_v17, %v395_v12  ;;  %v467_v30 = vpop.f32.mrb[6].mxu0  ;;  %530 = vmatprep.subr.bf16.mxu1 %v486_v24 }
 0x194   : > { %v468_v31 = vadd.f32 %v467_v30, %v400_v28  ;;  %v469_v32 = vpop.f32.mrb[7].mxu0  ;;  %531 = vmatpush1.bf16.msra.mxu1 %v485_v19  ;;  %v476_v34 = vmax.f32 %v464_v27, 0.0  ;;  %v1699_v19 = vsub.s32 6, %v1580_v21 }
 0x195   : > { %v470_v33 = vadd.f32 %v469_v32, %v400_v28  ;;  %v477_v36 = vmax.f32 %v466_v29, 0.0 }
 0x196   : > { %v478_v35 = vmax.f32 %v468_v31, 0.0  ;;  %v666_v31 = vpop.permute.xlu0 %665 }
 0x197   : > { %v479_v37 = vmax.f32 %v470_v33, 0.0 }
 0x198   : > { %v487_v38 = vpack.c.bf16 %v478_v35, %v476_v34  ;;  %v1706_v34 = vsub.s32 7, %v1580_v21 }
 0x199   : > { %v488_v39 = vpack.c.bf16 %v479_v37, %v477_v36 }
 0x19b   : > { %532 = vmatprep.subr.bf16.mxu1 %v488_v39 }
 0x19c   : > { %533 = vmatpush1.bf16.msra.mxu1 %v487_v38 }
 0x19f   : > { %1216 = vmatmul.mubr.msk.bf16.vlgmr.msra.gmra.mrb[0].mxu1 %vm412_vm0, %v1337_v40 }
 0x1a0   : > { %572 = vmatprep.mubr.bf16.mxu1 %v1403_v2  ;;  %v1663_v2 = vpop.permute.xlu1 %745 }
 0x1a4   : > { %v1665_v50 = vpop.permute.xlu1 %777 }
 0x1a7   : > { %1217 = vmatmul.mubr.msk.bf16.gmra.mrb[4].mxu1 %vm412_vm0, %v1338_v41 }
 0x1a8   : > { %v1667_v52 = vpop.permute.xlu1 %793 }
 0x1ac   : > { %v1671_v54 = vpop.permute.xlu1 %825 }
 0x1b0   : > { %v1673_v63 = vpop.permute.xlu1 %841 }
 0x1b4   : > { %v1695_v16 = vpop.permute.xlu1 %873 }
 0x272   : > { %v564_v55 = vpop.f32.mrb[0].mxu1 }
 0x273   : > { %v565_v56 = vadd.f32 %v564_v55, %v497_v51  ;;  %v566_v57 = vpop.f32.mrb[1].mxu1 }
 0x274   : > { %v567_v59 = vadd.f32 %v566_v57, %v497_v51  ;;  %v568_v60 = vpop.f32.mrb[2].mxu1 }
 0x275   : > { %v583_v61 = vmax.f32 %v565_v56, 0.0  ;;  %v570_v62 = vpop.f32.mrb[3].mxu1  ;;  %v569_v20 = vadd.f32 %v568_v60, %v502_v42 }
 0x276   : > { %v1677_v3 = vmax.f32 %v567_v59, 0.0  ;;  %v571_v35 = vadd.f32 %v570_v62, %v502_v42  ;;  %v1718_v42 = vpop.permute.xlu1 %889 }
 0x277   : > { %v607_v0 = vrot.slane %v583_v61, %v1586_v22  ;;  %v623_v1 = vrot.slane %v583_v61, %v1592_v25  ;;  %v639_v7 = vrot.slane %v583_v61, %v1589_v23  ;;  %v655_v8 = vrot.slane %v583_v61, %v1595_v26 }
 0x278   : > { %v611_v13 = vrot.slane %v1677_v3, %v1586_v22  ;;  %v627_v14 = vrot.slane %v1677_v3, %v1592_v25  ;;  %v671_v18 = vrot.slane %v583_v61, %v1680_v5  ;;  %v643_v29 = vrot.slane %v1677_v3, %v1589_v23 }
 0x279   : > { %v612_v6 = vmul.f32 %v607_v0, %v602_v58  ;;  %v628_v12 = vmul.f32 %v623_v1, %v618_v4  ;;  %v644_v17 = vmul.f32 %v639_v7, %v634_v45  ;;  %v660_v32 = vmul.f32 %v655_v8, %v1655_v46 }
 0x27a   : > { %v1687_v10 = vpop.f32.mrb[4].mxu1  ;;  %v613_v28 = vmul.f32 %v611_v13, %v602_v58  ;;  %v687_v33 = vrot.slane %v583_v61, %v1685_v9  ;;  %v629_v38 = vmul.f32 %v627_v14, %v618_v4  ;;  %v659_v39 = vrot.slane %v1677_v3, %v1595_v26  ;;  %v714_v4 = vpop.permute.xlu0 %713 }
 0x27b   : > { %v614_v11 = vadd.f32 %v612_v6, %v597_v44  ;;  %v1693_v15 = vpop.f32.mrb[5].mxu1  ;;  %v676_v40 = vmul.f32 %v671_v18, %v666_v31  ;;  %v703_v41 = vrot.slane %v583_v61, %v1699_v19  ;;  %v675_v51 = vrot.slane %v1677_v3, %v1680_v5 }
 0x27c   : > { %v578_v24 = vpop.f32.mrb[6].mxu1  ;;  %v615_v37 = vadd.f32 %v613_v28, %v597_v44  ;;  %v645_v21 = vmul.f32 %v643_v29, %v634_v45  ;;  %v1716_v58 = vmax.f32 %v569_v20, 0.0  ;;  %v692_v44 = vmul.f32 %v687_v33, %v1657_v47 }
 0x27d   : > { %v630_v27 = vadd.f32 %v628_v12, %v614_v11  ;;  %v580_v30 = vpop.f32.mrb[7].mxu1  ;;  %v1714_v55 = vadd.f32 %v578_v24, %v1653_v43  ;;  %v719_v59 = vrot.slane %v583_v61, %v1706_v34  ;;  %v661_v0 = vmul.f32 %v659_v39, %v1655_v46 }
 0x27e   : > { %v631_v57 = vadd.f32 %v629_v38, %v615_v37  ;;  %v691_v1 = vrot.slane %v1677_v3, %v1685_v9  ;;  %v708_v6 = vmul.f32 %v703_v41, %v1659_v48  ;;  %v677_v7 = vmul.f32 %v675_v51, %v666_v31  ;;  %v762_v33 = vpop.permute.xlu0 %761 }
 0x27f   : > { %v646_v36 = vadd.f32 %v644_v17, %v630_v27  ;;  %v707_v45 = vrot.slane %v1677_v3, %v1699_v19  ;;  %v735_v12 = vrot.slane %v1716_v58, %v1586_v22  ;;  %v1730_v61 = vmax.f32 %v571_v35, 0.0  ;;  %v1737_v27 = vpop.permute.xlu1 %921 }
 0x280   : > { %v647_v62 = vadd.f32 %v645_v21, %v631_v57  ;;  %v724_v13 = vmul.f32 %v719_v59, %v714_v4  ;;  %v723_v46 = vrot.slane %v1677_v3, %v1706_v34  ;;  %v693_v20 = vmul.f32 %v691_v1, %v1657_v47 }
 0x281   : > { %v662_v56 = vadd.f32 %v660_v32, %v646_v36  ;;  %v751_v24 = vrot.slane %v1716_v58, %v1592_v25  ;;  %v709_v17 = vmul.f32 %v707_v45, %v1659_v48  ;;  %v767_v28 = vrot.slane %v1716_v58, %v1589_v23 }
 0x282   : > { %v663_v11 = vadd.f32 %v661_v0, %v647_v62  ;;  %v740_v32 = vmul.f32 %v735_v12, %v1661_v49  ;;  %v739_v3 = vrot.slane %v1730_v61, %v1586_v22  ;;  %v725_v35 = vmul.f32 %v723_v46, %v714_v4 }
 0x283   : > { %v678_v60 = vadd.f32 %v676_v40, %v662_v56  ;;  %v783_v47 = vrot.slane %v1716_v58, %v1595_v26  ;;  %v756_v38 = vmul.f32 %v751_v24, %v1663_v2  ;;  %v755_v48 = vrot.slane %v1730_v61, %v1592_v25  ;;  %v1760_v59 = vpop.permute.xlu1 %937 }
 0x284   : > { %v679_v18 = vadd.f32 %v677_v7, %v663_v11  ;;  %v772_v39 = vmul.f32 %v767_v28, %v762_v33  ;;  %v799_v40 = vrot.slane %v1716_v58, %v1680_v5  ;;  %v575_v41 = vadd.f32 %v1687_v10, %v1669_v53 }
 0x285   : > { %v694_v8 = vadd.f32 %v692_v44, %v678_v60  ;;  %v1755_v51 = vadd.f32 %v580_v30, %v1653_v43  ;;  %v741_v21 = vmul.f32 %v739_v3, %v1661_v49  ;;  %v771_v44 = vrot.slane %v1730_v61, %v1589_v23  ;;  %v810_v30 = vpop.permute.xlu0 %809 }
 0x286   : > { %v695_v31 = vadd.f32 %v693_v20, %v679_v18  ;;  %v788_v60 = vmul.f32 %v783_v47, %v1665_v50  ;;  %v815_v62 = vrot.slane %v1716_v58, %v1685_v9  ;;  %v757_v10 = vmul.f32 %v755_v48, %v1663_v2 }
 0x287   : > { %v710_v14 = vadd.f32 %v708_v6, %v694_v8  ;;  %v787_v43 = vrot.slane %v1730_v61, %v1595_v26  ;;  %v804_v49 = vmul.f32 %v799_v40, %v1667_v52  ;;  %v831_v4 = vrot.slane %v1716_v58, %v1699_v19  ;;  %v1782_v24 = vpop.permute.xlu1 %969 }
 0x288   : > { %v711_v36 = vadd.f32 %v709_v17, %v695_v31  ;;  %v803_v6 = vrot.slane %v1730_v61, %v1680_v5  ;;  %v577_v7 = vadd.f32 %v1693_v15, %v1669_v53  ;;  %v773_v11 = vmul.f32 %v771_v44, %v762_v33 }
 0x289   : > { %v726_v29 = vadd.f32 %v724_v13, %v710_v14  ;;  %v1775_v12 = vmax.f32 %v575_v41, 0.0  ;;  %v820_v2 = vmul.f32 %v815_v62, %v810_v30  ;;  %v819_v13 = vrot.slane %v1730_v61, %v1685_v9 }
 0x28a   : > { %v727_v56 = vadd.f32 %v725_v35, %v711_v36  ;;  %v847_v46 = vrot.slane %v1716_v58, %v1706_v34  ;;  %v789_v18 = vmul.f32 %v787_v43, %v1665_v50  ;;  %v805_v53 = vmul.f32 %v803_v6, %v1667_v52 }
 0x28b   : > { %v742_v37 = vadd.f32 %v740_v32, %v726_v29  ;;  %v835_v15 = vrot.slane %v1730_v61, %v1699_v19  ;;  %v1787_v17 = vmax.f32 %v577_v7, 0.0  ;;  %v836_v31 = vmul.f32 %v831_v4, %v1671_v54  ;;  %v858_v32 = vpop.permute.xlu0 %857  ;;  %v1802_v41 = vpop.permute.xlu1 %985 }
 0x28c   : > { %v743_v1 = vadd.f32 %v741_v21, %v727_v56  ;;  %v863_v58 = vrot.slane %v1775_v12, %v1586_v22  ;;  %v821_v3 = vmul.f32 %v819_v13, %v810_v30  ;;  %v851_v50 = vrot.slane %v1730_v61, %v1706_v34 }
 0x28d   : > { %v758_v57 = vadd.f32 %v756_v38, %v742_v37  ;;  %v852_v52 = vmul.f32 %v847_v46, %v1673_v63  ;;  %v879_v47 = vrot.slane %v1775_v12, %v1592_v25  ;;  %v837_v36 = vmul.f32 %v835_v15, %v1671_v54 }
 0x28e   : > { %v759_v8 = vadd.f32 %v757_v10, %v743_v1  ;;  %v867_v37 = vrot.slane %v1787_v17, %v1586_v22  ;;  %v895_v40 = vrot.slane %v1775_v12, %v1589_v23  ;;  %v853_v61 = vmul.f32 %v851_v50, %v1673_v63 }
 0x28f   : > { %v774_v0 = vadd.f32 %v772_v39, %v758_v57  ;;  %v868_v39 = vmul.f32 %v863_v58, %v858_v32  ;;  %v883_v56 = vrot.slane %v1787_v17, %v1592_v25  ;;  %v884_v54 = vmul.f32 %v879_v47, %v1695_v16 }
 0x290   : > { %v775_v14 = vadd.f32 %v773_v11, %v759_v8  ;;  %v911_v44 = vrot.slane %v1775_v12, %v1595_v26  ;;  %v869_v62 = vmul.f32 %v867_v37, %v858_v32  ;;  %v900_v43 = vmul.f32 %v895_v40, %v1718_v42  ;;  %v1018_v8 = vpop.permute.xlu1 %1017 }
 0x291   : > { %v790_v45 = vadd.f32 %v788_v60, %v774_v0  ;;  %v906_v60 = vpop.permute.xlu0 %905  ;;  %v899_v0 = vrot.slane %v1787_v17, %v1589_v23  ;;  %v927_v63 = vrot.slane %v1775_v12, %v1680_v5  ;;  %v885_v30 = vmul.f32 %v883_v56, %v1695_v16 }
 0x292   : > { %v791_v28 = vadd.f32 %v789_v18, %v775_v14  ;;  %v916_v7 = vmul.f32 %v911_v44, %v906_v60  ;;  %v1821_v11 = vmax.f32 %v1714_v55, 0.0  ;;  %v931_v13 = vrot.slane %v1787_v17, %v1680_v5 }
 0x293   : > { %v806_v20 = vadd.f32 %v804_v49, %v790_v45  ;;  %v915_v49 = vrot.slane %v1787_v17, %v1595_v26  ;;  %v943_v45 = vrot.slane %v1775_v12, %v1685_v9  ;;  %v932_v14 = vmul.f32 %v927_v63, %v1737_v27 }
 0x294   : > { %v807_v33 = vadd.f32 %v805_v53, %v791_v28  ;;  %v959_v18 = vrot.slane %v1775_v12, %v1699_v19  ;;  %v947_v15 = vrot.slane %v1787_v17, %v1685_v9  ;;  %v933_v58 = vmul.f32 %v931_v13, %v1737_v27 }
 0x295   : > { %v822_v29 = vadd.f32 %v820_v2, %v806_v20  ;;  %v901_v2 = vmul.f32 %v899_v0, %v1718_v42  ;;  %v954_v20 = vpop.permute.xlu0 %953  ;;  %v917_v53 = vmul.f32 %v915_v49, %v906_v60  ;;  %v975_v42 = vrot.slane %v1775_v12, %v1706_v34 }
 0x296   : > { %v823_v38 = vadd.f32 %v821_v3, %v807_v33  ;;  %v963_v32 = vrot.slane %v1787_v17, %v1699_v19  ;;  %v964_v33 = vmul.f32 %v959_v18, %v954_v20  ;;  %v949_v47 = vmul.f32 %v947_v15, %v1760_v59 }
 0x297   : > { %v838_v35 = vadd.f32 %v836_v31, %v822_v29  ;;  %v948_v29 = vmul.f32 %v943_v45, %v1760_v59  ;;  %v1835_v31 = vmax.f32 %v1755_v51, 0.0  ;;  %v979_v12 = vrot.slane %v1787_v17, %v1706_v34 }
 0x298   : > { %v839_v57 = vadd.f32 %v837_v36, %v823_v38  ;;  %v980_v37 = vmul.f32 %v975_v42, %v1782_v24  ;;  %v1007_v27 = vrot.slane %v1821_v11, %v1592_v25  ;;  %v1023_v59 = vrot.slane %v1821_v11, %v1589_v23 }
 0x299   : > { %v854_v48 = vadd.f32 %v852_v52, %v838_v35  ;;  %v991_v35 = vrot.slane %v1821_v11, %v1586_v22  ;;  %v1034_v52 = vpop.permute.xlu1 %1033  ;;  %v1002_v38 = vpop.permute.xlu0 %1001  ;;  %v981_v17 = vmul.f32 %v979_v12, %v1782_v24  ;;  %v1039_v60 = vrot.slane %v1821_v11, %v1595_v26 }
 0x29a   : > { %v855_v1 = vadd.f32 %v853_v61, %v839_v57  ;;  %v1011_v57 = vrot.slane %v1835_v31, %v1592_v25  ;;  %v1012_v44 = vmul.f32 %v1007_v27, %v1002_v38  ;;  %v1027_v0 = vrot.slane %v1835_v31, %v1589_v23 }
 0x29b   : > { %v870_v21 = vadd.f32 %v868_v39, %v854_v48  ;;  %v965_v48 = vmul.f32 %v963_v32, %v954_v20  ;;  %v995_v39 = vrot.slane %v1835_v31, %v1586_v22  ;;  %v996_v56 = vmul.f32 %v991_v35, %v1802_v41 }
 0x29c   : > { %v871_v4 = vadd.f32 %v869_v62, %v855_v1  ;;  %v1055_v24 = vrot.slane %v1821_v11, %v1680_v5  ;;  %v1071_v25 = vrot.slane %v1821_v11, %v1685_v9  ;;  %v1059_v23 = vrot.slane %v1835_v31, %v1680_v5 }
 0x29d   : > { %v886_v10 = vadd.f32 %v884_v54, %v870_v21  ;;  %v1066_v62 = vpop.permute.xlu1 %1065  ;;  %v997_v22 = vmul.f32 %v995_v39, %v1802_v41  ;;  %v1050_v63 = vpop.permute.xlu0 %1049  ;;  %v1043_v41 = vrot.slane %v1835_v31, %v1595_v26  ;;  %v1103_v26 = vrot.slane %v1821_v11, %v1706_v34 }
 0x29e   : > { %v887_v46 = vadd.f32 %v885_v30, %v871_v4  ;;  %v1013_v30 = vmul.f32 %v1011_v57, %v1002_v38  ;;  %v1060_v13 = vmul.f32 %v1055_v24, %v1050_v63 }
 0x29f   : > { %v902_v6 = vadd.f32 %v900_v43, %v886_v10  ;;  %v1028_v43 = vmul.f32 %v1023_v59, %v1018_v8 }
 0x2a0   : > { %v903_v28 = vadd.f32 %v901_v2, %v887_v46  ;;  %v1087_v46 = vrot.slane %v1821_v11, %v1699_v19 }
 0x2a1   : > { %v918_v16 = vadd.f32 %v916_v7, %v902_v6  ;;  %v1044_v6 = vmul.f32 %v1039_v60, %v1034_v52  ;;  %v1029_v7 = vmul.f32 %v1027_v0, %v1018_v8  ;;  %v1082_v18 = vpop.permute.xlu1 %1081  ;;  %v1061_v8 = vmul.f32 %v1059_v23, %v1050_v63  ;;  %v1098_v5 = vpop.permute.xlu0 %1097 }
 0x2a2   : > { %v919_v3 = vadd.f32 %v917_v53, %v903_v28  ;;  %v1045_v53 = vmul.f32 %v1043_v41, %v1034_v52  ;;  %v1092_v42 = vmul.f32 %v1087_v46, %v1082_v18 }
 0x2a3   : > { %v934_v55 = vadd.f32 %v932_v14, %v918_v16  ;;  %v1075_v16 = vrot.slane %v1835_v31, %v1685_v9  ;;  %v1076_v14 = vmul.f32 %v1071_v25, %v1066_v62 }
 0x2a4   : > { %v935_v36 = vadd.f32 %v933_v58, %v919_v3  ;;  %v1107_v3 = vrot.slane %v1835_v31, %v1706_v34 }
 0x2a5   : > { %v950_v50 = vadd.f32 %v948_v29, %v934_v55  ;;  %v1091_v29 = vrot.slane %v1835_v31, %v1699_v19  ;;  %v1077_v58 = vmul.f32 %v1075_v16, %v1066_v62 }
 0x2a6   : > { %v951_v40 = vadd.f32 %v949_v47, %v935_v36  ;;  %v1109_v47 = vmul.f32 %v1107_v3, %v1098_v5 }
 0x2a7   : > { %v966_v51 = vadd.f32 %v964_v33, %v950_v50  ;;  %v1108_v50 = vmul.f32 %v1103_v26, %v1098_v5  ;;  %v1093_v11 = vmul.f32 %v1091_v29, %v1082_v18 }
 0x2a8   : > { %v967_v21 = vadd.f32 %v965_v48, %v951_v40 }
 0x2a9   : > { %v982_v61 = vadd.f32 %v980_v37, %v966_v51 }
 0x2aa   : > { %v983_v1 = vadd.f32 %v981_v17, %v967_v21 }
 0x2ab   : > { %v998_v54 = vadd.f32 %v996_v56, %v982_v61 }
 0x2ac   : > { %v999_v49 = vadd.f32 %v997_v22, %v983_v1 }
 0x2ad   : > { %v1014_v10 = vadd.f32 %v1012_v44, %v998_v54 }
 0x2ae   : > { %v1015_v45 = vadd.f32 %v1013_v30, %v999_v49 }
 0x2af   : > { %v1030_v4 = vadd.f32 %v1028_v43, %v1014_v10 }
 0x2b0   : > { %v1031_v20 = vadd.f32 %v1029_v7, %v1015_v45 }
 0x2b1   : > { %v1046_v2 = vadd.f32 %v1044_v6, %v1030_v4 }
 0x2b2   : > { %v1047_v28 = vadd.f32 %v1045_v53, %v1031_v20 }
 0x2b3   : > { %v1062_v15 = vadd.f32 %v1060_v13, %v1046_v2 }
 0x2b4   : > { %v1063_v9 = vadd.f32 %v1061_v8, %v1047_v28 }
 0x2b5   : > { %v1078_v55 = vadd.f32 %v1076_v14, %v1062_v15 }
 0x2b6   : > { %v1079_v33 = vadd.f32 %v1077_v58, %v1063_v9 }
 0x2b7   : > { %v1094_v32 = vadd.f32 %v1092_v42, %v1078_v55 }
 0x2b8   : > { %v1095_v52 = vadd.f32 %v1093_v11, %v1079_v33 }
 0x2b9   : > { %v1110_v35 = vadd.f32 %v1108_v50, %v1094_v32 }
 0x2ba   : > { %v1111_v12 = vadd.f32 %v1109_v47, %v1095_v52 }
 0x2bc   : > { %v1114_v19 = vcombine.low %v1110_v35, %v1111_v12 }
 0x2be   : > { %1116 = vst [vmem:[%s218_s9] sm:$0x77] %v1114_v19 }
 0x2bf   : > { %1352 = shalt.err (!%p1349_p3)
}
 0x2c0   : > { %s1353_s23 = scalar_lea.hbm %s1884_s13, 128  ;;  %s1357_s30 = scalar_lea.hbm %s1931_s5, 512 }
 0x2c1   : > { %p1354_p4 = scmp.ne.s32.totalorder %s1884_s13, %s1353_s23  ;;  %p1358_p9 = scmp.lt.u32.totalorder %s1884_s13, %s1931_s5 }
 0x2c2   : > { %p1359_p10 = scmp.lt.u32.totalorder %s1357_s30, %s1353_s23  ;;  %p1361_p12 = scmp.lt.u32.totalorder %s1353_s23, %s1884_s13 }
 0x2c3   : > { %p1355_p7 = pnand %p1354_p4, %p1504_p5 }
 0x2c4   : > { %p1360_p11 = por %p1359_p10, %p1358_p9 }
 0x2c5   : > { %p1356_p8 = pneg %p1355_p7 }
 0x2c6   : > { %p1362_p13 = por %p1361_p12, %p1360_p11 }
 0x2c8   : > { %p1363_p0 = pnand %p1362_p13, %p1356_p8 }
 0x2ca   : > { %1366 = shalt.err (!%p1363_p0)
}
 0x2cb   : > { %1225 = dma.vmem_to_hbm [thread:$0]  (%p1504_p5), %s1886_s10, 128, %s1884_s13, %s1118_s14  }
 0x2cc PF: > { %p1231_p1 = scmp.ge.s32.totalorder %s1401_s21, 2  ;;  %s1144_s8 = sand.u32 1, %s1389_s18  }
 0x2cd   : > { %s1145_s9 = scalar_lea.sflag [#allocation3], %s1144_s8 }
 0x2ce   : > { %p1228_p2 = pnand %p1231_p1, %p1508_p6 }
 0x2d0   : > { %1384 = dma.done.wait (!%p1228_p2), %s1145_s9, 128  }
 0x2d1   : > { %1386 = vsyncadd (!%p1228_p2), %s1145_s9, 4294967168  ;;  %p15_p3 = scmp.ge.s32.totalorder %s1491_s24, 6   ;;  %s1934_s18 = smov %s1393_s19 }
 0x2d2   : > { %s1935_s19 = smov %s1397_s20  ;;  %s1936_s20 = smov %s1502_s27 }
 0x2d3   : > { %s1937_s21 = smov %s1491_s24  ;;  %17 = sbr.rel (!%p15_p3) target bundleno = 3 (0x3), region = 79 }
 0x2da   :  { %1150 = vsyncpa [#allocation3], 1 }
 0x2db   :  { %1152 = vsyncpa [#allocation3 + $0x1], 1 }

</bundles_post_ra>
